<compile_context>
chip_gen: v6e
topology: v6e:2x2x1
jax: 0.10.0
libtpu: 0.0.40
codegen_flags: <defaults>
</compile_context>

<pallas_src>
import jax
import jax.numpy as jnp
from jax.experimental import pallas as pl
from jax.experimental.pallas import tpu as pltpu

_MAX_TILE_G = 4096                     # lanes per block (multiple of 128)
_MAX_TILE_N = 2048                     # rows per block (multiple of 8/16)
_IO_BUDGET_BYTES = 32 * 1024 * 1024    # 2 inputs x 2 pipeline buffers fit here
_VMEM_LIMIT_BYTES = 48 * 1024 * 1024   # scoped VMEM (<= 64 MiB v7x physical)


def _round_up(x, m):
    return ((x + m - 1) // m) * m


def _choose_tiles(n, g, itemsize):
    """Pick (tile_n, tile_g): lane-aligned, within the I/O budget, >=2 row blocks."""
    row_mult = 8 if itemsize >= 4 else 16  # sublane packing for bf16/fp16
    tile_g = min(_round_up(g, 128), _MAX_TILE_G)
    # 2 inputs x 2 pipeline buffers x tile_n x tile_g x itemsize <= budget
    max_rows = max(row_mult, _IO_BUDGET_BYTES // (4 * tile_g * itemsize))
    tile_n = min(_round_up(n, row_mult), (max_rows // row_mult) * row_mult, _MAX_TILE_N)
    tile_n = max(tile_n, row_mult)
    # v7x has 2 TensorCores; only the "parallel" row axis shards across them.
    # Guarantee >= 2 row blocks when the problem allows it.
    while pl.cdiv(n, tile_n) < 2 and tile_n > row_mult:
        new_tile_n = max(row_mult, _round_up(tile_n // 2, row_mult))
        if new_tile_n == tile_n:
            break
        tile_n = new_tile_n
    return tile_n, tile_g


def _make_msle_kernel(n, g, tile_n, tile_g):
    """Kernel closure over static shapes (no SMEM scalars needed)."""
    mask_rows = (n % tile_n) != 0
    mask_cols = (g % tile_g) != 0

    def kernel(pred_ref, true_ref, part_ref):
        j = pl.program_id(1)  # gene (reduction) axis, last in grid

        @pl.when(j == 0)
        def _init():
            part_ref[...] = jnp.zeros_like(part_ref)

        p = jnp.maximum(pred_ref[...].astype(jnp.float32), 0.0)
        t = jnp.maximum(true_ref[...].astype(jnp.float32), 0.0)
        d = jnp.log1p(p) - jnp.log1p(t)
        dd = d * d

        # Zero out-of-range rows/lanes of ragged tail blocks (select, so any
        # garbage/NaN from the undefined out-of-bounds region is dropped).
        if mask_rows or mask_cols:
            ok = None
            if mask_rows:
                i = pl.program_id(0)
                rows = jax.lax.broadcasted_iota(jnp.int32, dd.shape, 0) + i * tile_n
                ok = rows < n
            if mask_cols:
                cols = jax.lax.broadcasted_iota(jnp.int32, dd.shape, 1) + j * tile_g
                cok = cols < g
                ok = cok if ok is None else (ok & cok)
            dd = jnp.where(ok, dd, 0.0)

        # Layout-preserving sublane-block fold: trailing dims stay (8, tile_g),
        # so this is pure vreg adds (no VMEM relayout / XLU traffic).
        fold = dd.reshape(tile_n // 8, 8, tile_g).sum(axis=0)
        part_ref[...] += fold.reshape(part_ref.shape)

    return kernel


def msle_loss(pred, true):
    """Mean squared log error via a Pallas TPU kernel.

    pred, true: float arrays of shape [N, G] (rows = spots, cols = genes).
    Arbitrary N, G supported (ragged edges masked in-kernel, no padding pass).
    """
    assert pred.shape == true.shape, "pred/true must have the same shape"
    assert pred.ndim == 2, "expected 2-D [spots, genes] matrices"
    n, g = pred.shape
    total_count = n * g  # mean over the ORIGINAL elements

    itemsize = max(jnp.dtype(pred.dtype).itemsize, jnp.dtype(true.dtype).itemsize)
    tile_n, tile_g = _choose_tiles(n, g, itemsize)
    n_row_blocks = pl.cdiv(n, tile_n)
    n_gene_blocks = pl.cdiv(g, tile_g)

    partials = pl.pallas_call(
        _make_msle_kernel(n, g, tile_n, tile_g),
        out_shape=jax.ShapeDtypeStruct((n_row_blocks, 8, tile_g), jnp.float32),
        grid_spec=pltpu.PrefetchScalarGridSpec(
            num_scalar_prefetch=0,
            grid=(n_row_blocks, n_gene_blocks),
            in_specs=[
                pl.BlockSpec((tile_n, tile_g), lambda i, j: (i, j)),
                pl.BlockSpec((tile_n, tile_g), lambda i, j: (i, j)),
            ],
            # Block index constant across j -> output tile resident across the
            # reduction axis; accumulate directly into it (no scratch).
            out_specs=pl.BlockSpec((1, 8, tile_g), lambda i, j: (i, 0, 0)),
        ),
        compiler_params=pltpu.CompilerParams(
            dimension_semantics=("parallel", "arbitrary"),
            vmem_limit_bytes=_VMEM_LIMIT_BYTES,
        ),
    )(pred, true)

    # Tiny final cross-lane reduce over per-row-block partials, then the mean.
    return jnp.sum(partials) / jnp.float32(total_count)


def msle_loss_ref(pred, true):
    p = jnp.log1p(jnp.clip(pred.astype(jnp.float32), 0.0))
    t = jnp.log1p(jnp.clip(true.astype(jnp.float32), 0.0))
    return jnp.mean((p - t) ** 2)


if __name__ == "__main__":
    key = jax.random.PRNGKey(0)
    k1, k2, k3, k4 = jax.random.split(key, 4)

    # Small shapes consistent with the module's usage:
    # pred = linear transform of a reference basis (spots x genes),
    # true = mixture expression matrix of the same shape.
    N, G = 64, 256
    pred = jax.random.normal(k1, (N, G), dtype=jnp.float32) * 2.0 + 1.0
    true = jax.random.normal(k2, (N, G), dtype=jnp.float32) * 2.0 + 1.0

    loss = jax.block_until_ready(msle_loss(pred, true))
    ref = jax.block_until_ready(msle_loss_ref(pred, true))
    assert jnp.allclose(loss, ref, rtol=1e-4, atol=1e-6), (loss, ref)

    # Ragged (non tile-aligned) shape exercises the in-kernel edge masking.
    N2, G2 = 37, 300
    pred2 = jax.random.normal(k3, (N2, G2), dtype=jnp.float32) * 2.0 + 1.0
    true2 = jax.random.normal(k4, (N2, G2), dtype=jnp.float32) * 2.0 + 1.0

    loss2 = jax.block_until_ready(msle_loss(pred2, true2))
    ref2 = jax.block_until_ready(msle_loss_ref(pred2, true2))
    assert jnp.allclose(loss2, ref2, rtol=1e-4, atol=1e-6), (loss2, ref2)

    print("KERNEL_OK")
</pallas_src>

<mosaic_0001>
module attributes {stable_mosaic.version = 11 : i64} {
  func.func @kernel(%arg0: i32, %arg1: i32, %arg2: memref<32x256xf32, #tpu.memory_space<vmem>>, %arg3: memref<32x256xf32, #tpu.memory_space<vmem>>, %arg4: memref<1x8x256xf32, #tpu.memory_space<vmem>>) attributes {dimension_semantics = [#tpu.dimension_semantics<parallel>, #tpu.dimension_semantics<arbitrary>], iteration_bounds = array<i64: 2, 1>, scalar_prefetch = 0 : i64, scratch_operands = 0 : i64, tpu.core_type = #tpu.core_type<tc>, window_params = [{transform_indices = @transform_0, window_bounds = array<i64: 32, 256>}, {transform_indices = @transform_1, window_bounds = array<i64: 32, 256>}, {transform_indices = @transform_2, window_bounds = array<i64: 1, 8, 256>}]} {
    %c0_i32 = arith.constant 0 : i32
    %0 = arith.cmpi eq, %arg1, %c0_i32 : i32
    %1 = arith.extui %0 : i1 to i32
    %c0_i32_0 = arith.constant 0 : i32
    %2 = arith.cmpi ne, %1, %c0_i32_0 : i32
    scf.if %2 {
      %cst_12 = arith.constant 0.000000e+00 : f32
      %19 = vector.broadcast %cst_12 : f32 to vector<1x8x256xf32>
      %c0_13 = arith.constant 0 : index
      %c0_14 = arith.constant 0 : index
      %c0_15 = arith.constant 0 : index
      %20 = vector.load %arg4[%c0_13, %c0_14, %c0_15] : memref<1x8x256xf32, #tpu.memory_space<vmem>>, vector<1x8x256xf32>
      tpu.vector_store %arg4[%c0_13, %c0_14, %c0_15], %19 {strides = array<i32>} : memref<1x8x256xf32, #tpu.memory_space<vmem>>, vector<1x8x256xf32>,
    } else {
    }
    %c0 = arith.constant 0 : index
    %c0_1 = arith.constant 0 : index
    %3 = vector.load %arg2[%c0, %c0_1] : memref<32x256xf32, #tpu.memory_space<vmem>>, vector<32x256xf32>
    %cst = arith.constant 0.000000e+00 : f32
    %4 = vector.broadcast %cst : f32 to vector<32x256xf32>
    %5 = arith.maximumf %3, %4 : vector<32x256xf32>
    %c0_2 = arith.constant 0 : index
    %c0_3 = arith.constant 0 : index
    %6 = vector.load %arg3[%c0_2, %c0_3] : memref<32x256xf32, #tpu.memory_space<vmem>>, vector<32x256xf32>
    %cst_4 = arith.constant 0.000000e+00 : f32
    %7 = vector.broadcast %cst_4 : f32 to vector<32x256xf32>
    %8 = arith.maximumf %6, %7 : vector<32x256xf32>
    %9 = math.log1p %5 : vector<32x256xf32>
    %10 = math.log1p %8 : vector<32x256xf32>
    %11 = arith.subf %9, %10 : vector<32x256xf32>
    %12 = arith.mulf %11, %11 : vector<32x256xf32>
    %13 = vector.shape_cast %12 : vector<32x256xf32> to vector<4x8x256xf32>
    %cst_5 = arith.constant dense<0.000000e+00> : vector<8x256xf32>
    %14 = vector.multi_reduction <add>, %13, %cst_5 [0] : vector<4x8x256xf32> to vector<8x256xf32>
    %c0_6 = arith.constant 0 : index
    %c0_7 = arith.constant 0 : index
    %c0_8 = arith.constant 0 : index
    %15 = vector.load %arg4[%c0_6, %c0_7, %c0_8] : memref<1x8x256xf32, #tpu.memory_space<vmem>>, vector<1x8x256xf32>
    %16 = vector.shape_cast %14 : vector<8x256xf32> to vector<1x8x256xf32>
    %17 = arith.addf %15, %16 : vector<1x8x256xf32>
    %c0_9 = arith.constant 0 : index
    %c0_10 = arith.constant 0 : index
    %c0_11 = arith.constant 0 : index
    %18 = vector.load %arg4[%c0_9, %c0_10, %c0_11] : memref<1x8x256xf32, #tpu.memory_space<vmem>>, vector<1x8x256xf32>
    tpu.vector_store %arg4[%c0_9, %c0_10, %c0_11], %17 {strides = array<i32>} : memref<1x8x256xf32, #tpu.memory_space<vmem>>, vector<1x8x256xf32>,
    return
  }
  func.func @transform_0(%arg0: i32, %arg1: i32) -> (i32, i32) {
    %c0_i32 = arith.constant 0 : i32
    return %arg0, %arg1 : i32, i32
  }
  func.func @transform_1(%arg0: i32, %arg1: i32) -> (i32, i32) {
    %c0_i32 = arith.constant 0 : i32
    return %arg0, %arg1 : i32, i32
  }
  func.func @transform_2(%arg0: i32, %arg1: i32) -> (i32, i32, i32) {
    %c0_i32 = arith.constant 0 : i32
    %c0_i32_0 = arith.constant 0 : i32
    %c0_i32_1 = arith.constant 0 : i32
    return %arg0, %c0_i32, %c0_i32_0 : i32, i32, i32
  }
}

</mosaic_0001>

<bundles_post_ra>
// kernel: tpu_custom_call.1
= control target key start
LH: loop header
LB: loop body
LE: loop exit
PB: predicated region body
PF: predicated region fallthrough
CT: control target
= control target key end

     0   :  { %7 = vsyncpa [#allocation3], 0  ;;  %s1187_s0 = inlined_call_operand.hbm [shape: f32[64,256], index: 0, kind: input, shape index: {}]   ;;  %s1188_s1 = inlined_call_operand.hbm [shape: f32[64,256], index: 1, kind: input, shape index: {}]   ;;  %s1189_s2 = inlined_call_operand.hbm [shape: f32[2,8,256], index: 2, kind: output, shape index: {}]  }
   0x1   :  { %9 = vsyncpa [#allocation3 + $0x1], 0 }
   0x2   :  { %10 = vsyncpa [#allocation6], 0 }
   0x3   :  { %12 = vsyncpa [#allocation6 + $0x1], 0 }
   0x4   :  { %13 = vsyncpa [#allocation4], 0 }
   0x5   :  { %15 = vsyncpa [#allocation4 + $0x1], 0  ;;  %s850_s9 = smov 0   ;;  %s852_s10 = smov 0  }
   0x6   :  { %s854_s11 = smov 0   ;;  %s856_s12 = smov 0  }
   0x7   :  { %s858_s13 = smov 0   ;;  %s860_s14 = smov 0  }
   0x8 LB: > { %s560_s15 = sadd.s32 4294967295, %s828_s14   ;;  %s561_s16 = sadd.s32 4294967294, %s828_s14   ;;  %s828_s14 = sphi %s860_s14, %s21_s14   ;;  %s824_s13 = sphi %s858_s13, %s1227_s13   ;;  %s820_s12 = sphi %s856_s12, %s1226_s12   ;;  %s816_s11 = sphi %s854_s11, %s1225_s11   ;;  %s812_s10 = sphi %s852_s10, %s1224_s10   ;;  %s808_s9 = sphi %s850_s9, %s1223_s9  }
   0x9   : > { %s33_s17 = sadd.s32 1, %s824_s13  ;;  %s42_s18 = sadd.s32 1, %s816_s11 }
   0xa   : > { %p35_p0 = scmp.ge.s32.totalorder %s33_s17, 2  ;;  %p49_p1 = scmp.ne.s32.totalorder %s816_s11, %s812_s10 }
   0xb   : > { %p50_p2 = scmp.eq.s32.totalorder %s828_s14, 0  ;;  %p55_p3 = scmp.ne.s32.totalorder %s812_s10, %s808_s9 }
   0xc   : > { %s1229_s17 = smov (%p35_p0, %s33_s17), 0  ;;  %p56_p5 = scmp.eq.s32.totalorder %s560_s15, 0 }
   0xd   : > { %p891_p4 = por %p50_p2, %p49_p1  ;;  %s37_s20 = ssub.s32 %s824_s13, %s1229_s17 }
   0xe   : > { %p107_p6 = scmp.eq.s32.totalorder %s560_s15, 1  ;;  %p40_p7 = scmp.eq.s32.totalorder %s37_s20, 0 }
   0xf   : > { %p897_p8 = por %p56_p5, %p55_p3  ;;  %p113_p10 = scmp.eq.s32.totalorder %s561_s16, 1 }
  0x10   : > { %p901_p9 = por %p107_p6, %p49_p1  ;;  %p603_p13 = scmp.lt.s32.totalorder %s828_s14, 2 }
  0x11   : > { %s906_s23 = scalar_select %p40_p7, %s816_s11, %s42_s18  }
  0x12   : > { %p908_p11 = por %p113_p10, %p55_p3  ;;  %s915_s25 = sand.u32 1, %s816_s11  }
  0x13   : > { %s564_s26 = sshll.u32 %s915_s25, 6  ;;  %s582_s27 = sshll.u32 %s824_s13, 10 }
  0x14   : > { %s146_s30 = scalar_lea.hbm %s1187_s0, %s582_s27  ;;  %s137_s3 = scalar_lea.vmem [#allocation2], %s564_s26 }
  0x15   : > { %s147_s4 = sshll.u32 %s137_s3, 4  ;;  %p928_p0 = pnand %p603_p13, %p891_p4  ;;  %s148_s4 = int_to_ptr.vmem [resolvable:$true] %s147_s4 }
  0x16   : > { %p572_p1 = scmp.ge.s32.totalorder %s828_s14, 1  ;;  %s134_s6 = scalar_lea.sflag [#allocation3], %s915_s25 }
  0x17   : > { %p690_p2 = pneg %p928_p0  ;;  %s701_s7 = scalar_lea.vmem %s148_s4, 1024 }
  0x18   : > { %p702_p3 = scmp.ne.s32.totalorder %s148_s4, %s701_s7  ;;  %s830_s8 = smov [#allocation2]  }
  0x19   : > { %s706_s15 = sshll.u32 %s830_s8, 4  ;;  %s707_s15 = int_to_ptr.vmem [resolvable:$false] %s706_s15 }
  0x1a   : > { %p704_p5 = pnand %p702_p3, %p690_p2  ;;  %s708_s16 = scalar_lea.vmem %s707_s15, 2048 }
  0x1b   : > { %p709_p4 = scmp.lt.s32.totalorder %s148_s4, %s707_s15  ;;  %p710_p7 = scmp.lt.s32.totalorder %s708_s16, %s701_s7 }
  0x1c   : > { %p705_p6 = pneg %p704_p5 }
  0x1d   : > { %p711_p10 = por %p710_p7, %p709_p4 }
  0x1f   : > { %p712_p13 = pnand %p711_p10, %p705_p6 }
  0x21   : > { %715 = shalt.err (!%p712_p13)
}
  0x22   : > { %s831_s18 = smov 256   ;;  %s832_s19 = smov 16  }
  0x23   : > { %595 = dma.hbm_to_vmem [thread:$0]  (!%p928_p0), %s146_s30, 1024, %s148_s4, %s134_s6, %s831_s18, %s831_s18, %s832_s19  }
  0x24   : > { %p179_p3 = scmp.lt.s32.totalorder %s828_s14, 3  ;;  %s170_s29 = scalar_lea.hbm %s1188_s1, %s582_s27 }
  0x25   : > { %s161_s7 = scalar_lea.vmem [#allocation5], %s564_s26  ;;  %s158_s15 = scalar_lea.sflag [#allocation6], %s915_s25 }
  0x26   : > { %p949_p5 = pnand %p572_p1, %p179_p3  ;;  %s171_s8 = sshll.u32 %s161_s7, 4  ;;  %s172_s8 = int_to_ptr.vmem [resolvable:$true] %s171_s8 }
  0x27   : > { %s729_s16 = scalar_lea.vmem %s172_s8, 1024  ;;  %s833_s30 = smov [#allocation5]  }
  0x28   : > { %p730_p6 = scmp.ne.s32.totalorder %s172_s8, %s729_s16  ;;  %s734_s4 = sshll.u32 %s833_s30, 4  ;;  %s735_s4 = int_to_ptr.vmem [resolvable:$false] %s734_s4 }
  0x29   : > { %s736_s27 = scalar_lea.vmem %s735_s4, 2048  ;;  %p737_p10 = scmp.lt.s32.totalorder %s172_s8, %s735_s4 }
  0x2a   : > { %p732_p4 = pnand %p730_p6, %p690_p2  ;;  %p738_p1 = scmp.lt.s32.totalorder %s736_s27, %s729_s16 }
  0x2c   : > { %p733_p7 = pneg %p732_p4  ;;  %p739_p13 = por %p738_p1, %p737_p10 }
  0x2e   : > { %p740_p3 = pnand %p739_p13, %p733_p7 }
  0x30   : > { %743 = shalt.err (!%p740_p3)
}
  0x31   : > { %598 = dma.hbm_to_vmem [thread:$0]  (!%p928_p0), %s170_s29, 1024, %s172_s8, %s158_s15, %s831_s18, %s831_s18, %s832_s19  }
  0x32   : > { %183 = sbr.rel (%p949_p5) target bundleno = 126 (0x7e), region = 28  ;;  %s964_s25 = sand.u32 (!%p949_p5), 1, %s812_s10  }
  0x33   : > { %s573_s26 = sshll.u32 (!%p949_p5), %s964_s25, 6  ;;  %s186_s6 = scalar_lea.sflag (!%p949_p5), [#allocation3], %s964_s25 }
  0x34   : > { %s968_s20 = scalar_lea.vmem (!%p949_p5), [#allocation2], %s573_s26 }
  0x37   : > { %795 = dma.done.wait (%p897_p8), %s186_s6, 1024  }
  0x38   : > { %797 = vsyncadd (%p897_p8), %s186_s6, 4294966272  ;;  %s195_s5 = scalar_lea.sflag [#allocation6], %s964_s25  ;;  %s975_s18 = scalar_lea.vmem [#allocation5], %s573_s26 }
  0x39   : > { %799 = dma.done.wait (%p897_p8), %s195_s5, 1024  }
  0x3a   : > { %801 = vsyncadd (%p897_p8), %s195_s5, 4294966272  ;;  %v234_v0 = vld [vmem:[%s968_s20] sm:$0xff]  ;;  %v236_v1 = vld [vmem:[%s968_s20 + $0x10] sm:$0xff]  ;;  %s575_s21 = sshll.u32 %s964_s25, 4  ;;  %s585_s28 = sshll.u32 %s820_s12, 8 }
  0x3b   : > { %v238_v2 = vld [vmem:[%s968_s20 + $0x20] sm:$0xff]  ;;  %v240_v3 = vld [vmem:[%s968_s20 + $0x30] sm:$0xff]  ;;  %v242_v4 = vmax.f32 %v234_v0, 0.0  ;;  %v244_v5 = vmax.f32 %v236_v1, 0.0  ;;  %v235_v32 = vld [vmem:[%s968_s20 + $0x8] sm:$0xff]  ;;  %s1101_s19 = scalar_lea.vmem [#allocation7], %s575_s21  ;;  %s451_s8 = scalar_lea.hbm %s1189_s2, %s585_s28 }
  0x3c   : > { %v246_v6 = vmax.f32 %v238_v2, 0.0  ;;  %v250_v7 = vld [vmem:[%s975_s18] sm:$0xff]  ;;  %v248_v9 = vmax.f32 %v240_v3, 0.0  ;;  %v252_v10 = vld [vmem:[%s975_s18 + $0x10] sm:$0xff]  ;;  %v237_v40 = vld [vmem:[%s968_s20 + $0x18] sm:$0xff]  ;;  %v1009_v44 = vmax.f32 %v235_v32, 0.0 }
  0x3d   : > { %v266_v8 = vadd.f32 1.0, %v242_v4  ;;  %v284_v11 = vadd.f32 1.0, %v244_v5  ;;  %v254_v12 = vld [vmem:[%s975_s18 + $0x20] sm:$0xff]  ;;  %v258_v13 = vmax.f32 %v250_v7, 0.0  ;;  %v256_v15 = vld [vmem:[%s975_s18 + $0x30] sm:$0xff]  ;;  %v989_v16 = vmax.f32 %v252_v10, 0.0 }
  0x3e   : > { %v302_v14 = vadd.f32 1.0, %v246_v6  ;;  %v991_v17 = vmax.f32 %v254_v12, 0.0  ;;  %v320_v18 = vadd.f32 1.0, %v248_v9  ;;  %v993_v20 = vmax.f32 %v256_v15, 0.0  ;;  %v239_v59 = vld [vmem:[%s968_s20 + $0x28] sm:$0xff]  ;;  %v241_v60 = vld [vmem:[%s968_s20 + $0x38] sm:$0xff] }
  0x3f   : > { %656 = vlog2.f32 %v266_v8  ;;  %v338_v19 = vadd.f32 1.0, %v258_v13  ;;  %v269_v21 = vmul.f32 -0.5, %v242_v4  ;;  %v272_v22 = vand.u32 2147483647, %v242_v4  ;;  %v251_v1 = vld [vmem:[%s975_s18 + $0x8] sm:$0xff]  ;;  %s453_s29 = sshll.u32 %s1101_s19, 4  ;;  %s454_s29 = int_to_ptr.vmem [resolvable:$true] %s453_s29 }
  0x40   : > { %658 = vlog2.f32 %v284_v11  ;;  %v287_v23 = vmul.f32 -0.5, %v244_v5  ;;  %v305_v24 = vmul.f32 -0.5, %v246_v6  ;;  %v356_v25 = vadd.f32 1.0, %v989_v16  ;;  %v253_v11 = vld [vmem:[%s975_s18 + $0x18] sm:$0xff]  ;;  %v255_v33 = vld [vmem:[%s975_s18 + $0x28] sm:$0xff]  ;;  %s439_s15 = scalar_lea.sflag [#allocation4], %s964_s25 }
  0x41   : > { %660 = vlog2.f32 %v302_v14  ;;  %v323_v26 = vmul.f32 -0.5, %v248_v9  ;;  %v374_v27 = vadd.f32 1.0, %v991_v17  ;;  %v290_v28 = vand.u32 2147483647, %v244_v5  ;;  %s744_s16 = scalar_lea.vmem %s454_s29, 256  ;;  %s834_s30 = smov [#allocation7]  }
  0x42   : > { %662 = vlog2.f32 %v320_v18  ;;  %v341_v29 = vmul.f32 -0.5, %v258_v13  ;;  %v270_v30 = vadd.f32 1.0, %v269_v21  ;;  %v392_v31 = vadd.f32 1.0, %v993_v20  ;;  %p745_p8 = scmp.ne.s32.totalorder %s454_s29, %s744_s16  ;;  %s748_s4 = sshll.u32 %s834_s30, 4  ;;  %s749_s4 = int_to_ptr.vmem [resolvable:$false] %s748_s4 }
  0x43   : > { %664 = vlog2.f32 %v338_v19  ;;  %vm999_vm0 = vcmp.lt.f32.partialorder %v272_v22, 0.0004427343  ;;  %v288_v34 = vadd.f32 1.0, %v287_v23  ;;  %v306_v35 = vadd.f32 1.0, %v305_v24  ;;  %s750_s27 = scalar_lea.vmem %s749_s4, 512  ;;  %p751_p5 = scmp.lt.s32.totalorder %s454_s29, %s749_s4 }
  0x44   : > { %666 = vlog2.f32 %v356_v25  ;;  %v359_v36 = vmul.f32 -0.5, %v989_v16  ;;  %v308_v37 = vand.u32 2147483647, %v246_v6  ;;  %v324_v38 = vadd.f32 1.0, %v323_v26  ;;  %p746_p0 = pnand %p745_p8, %p901_p9  ;;  %p752_p6 = scmp.lt.s32.totalorder %s750_s27, %s744_s16 }
  0x45   : > { %668 = vlog2.f32 %v374_v27  ;;  %v326_v39 = vand.u32 2147483647, %v248_v9  ;;  %vm1005_vm1 = vcmp.lt.f32.partialorder %v290_v28, 0.0004427343  ;;  %v342_v42 = vadd.f32 1.0, %v341_v29 }
  0x46   : > { %670 = vlog2.f32 %v392_v31  ;;  %v344_v43 = vand.u32 2147483647, %v258_v13  ;;  %v271_v46 = vmul.f32 %v270_v30, %v242_v4  ;;  %v362_v47 = vand.u32 2147483647, %v989_v16  ;;  %p747_p2 = pneg %p746_p0  ;;  %p753_p4 = por %p752_p6, %p751_p5 }
  0x47   : > { %v377_v48 = vmul.f32 -0.5, %v991_v17  ;;  %v395_v49 = vmul.f32 -0.5, %v993_v20  ;;  %v289_v50 = vmul.f32 %v288_v34, %v244_v5  ;;  %v360_v51 = vadd.f32 1.0, %v359_v36 }
  0x48   : > { %v380_v52 = vand.u32 2147483647, %v991_v17  ;;  %v1015_v53 = vmax.f32 %v237_v40, 0.0  ;;  %v307_v55 = vmul.f32 %v306_v35, %v246_v6  ;;  %vm1017_vm2 = vcmp.lt.f32.partialorder %v308_v37, 0.0004427343  ;;  %p754_p7 = pnand %p753_p4, %p747_p2 }
  0x49   : > { %v325_v57 = vmul.f32 %v324_v38, %v248_v9  ;;  %vm1021_vm3 = vcmp.lt.f32.partialorder %v326_v39, 0.0004427343  ;;  %v343_v63 = vmul.f32 %v342_v42, %v258_v13  ;;  %vm1027_vm4 = vcmp.lt.f32.partialorder %v344_v43, 0.0004427343 }
  0x4a   : > { %v275_v2 = vadd.f32 1.0, %v1009_v44  ;;  %vm1033_vm5 = vcmp.lt.f32.partialorder %v362_v47, 0.0004427343  ;;  %v378_v4 = vadd.f32 1.0, %v377_v48  ;;  %v396_v5 = vadd.f32 1.0, %v395_v49 }
  0x4b   : > { %v398_v6 = vand.u32 2147483647, %v993_v20  ;;  %v361_v9 = vmul.f32 %v360_v51, %v989_v16  ;;  %vm1039_vm6 = vcmp.lt.f32.partialorder %v380_v52, 0.0004427343  ;;  %v293_v12 = vadd.f32 1.0, %v1015_v53 }
  0x4c   : > { %v657_v45 = vpop.eup %656  ;;  %v1045_v15 = vmax.f32 %v239_v59, 0.0  ;;  %v1047_v18 = vmax.f32 %v241_v60, 0.0  ;;  %v1049_v19 = vmax.f32 %v251_v1, 0.0  ;;  %672 = vlog2.f32 %v275_v2 }
  0x4d   : > { %v659_v54 = vpop.eup %658  ;;  %v268_v62 = vmul.f32 0.6931472, %v657_v45  ;;  %v379_v24 = vmul.f32 %v378_v4, %v991_v17  ;;  %v397_v25 = vmul.f32 %v396_v5, %v993_v20  ;;  %vm1055_vm7 = vcmp.lt.f32.partialorder %v398_v6, 0.0004427343 }
  0x4e   : > { %v661_v61 = vpop.eup %660  ;;  %v286_v8 = vmul.f32 0.6931472, %v659_v54  ;;  %v1059_v27 = vmax.f32 %v253_v11, 0.0  ;;  %674 = vlog2.f32 %v293_v12  ;;  %v311_v34 = vadd.f32 1.0, %v1045_v15 }
  0x4f   : > { %v663_v7 = vpop.eup %662  ;;  %v304_v14 = vmul.f32 0.6931472, %v661_v61  ;;  %v274_v21 = vsel %vm999_vm0, %v271_v46, %v268_v62  ;;  %v329_v38 = vadd.f32 1.0, %v1047_v18  ;;  %v347_v39 = vadd.f32 1.0, %v1049_v19  ;;  %v257_v46 = vld [vmem:[%s975_s18 + $0x38] sm:$0xff] }
  0x50   : > { %v665_v13 = vpop.eup %664  ;;  %v322_v22 = vmul.f32 0.6931472, %v663_v7  ;;  %v292_v29 = vsel %vm1005_vm1, %v289_v50, %v286_v8  ;;  %v1078_v47 = vmax.f32 %v255_v33, 0.0  ;;  %v365_v50 = vadd.f32 1.0, %v1059_v27 }
  0x51   : > { %v340_v16 = vmul.f32 0.6931472, %v665_v13  ;;  %v667_v23 = vpop.eup %666  ;;  %v310_v17 = vsel %vm1017_vm2, %v307_v55, %v304_v14  ;;  %676 = vlog2.f32 %v347_v39  ;;  %v278_v54 = vmul.f32 -0.5, %v1009_v44 }
  0x52   : > { %v669_v28 = vpop.eup %668  ;;  %v358_v31 = vmul.f32 0.6931472, %v667_v23  ;;  %v328_v36 = vsel %vm1021_vm3, %v325_v57, %v322_v22  ;;  %678 = vlog2.f32 %v311_v34  ;;  %v1084_v56 = vmax.f32 %v257_v46, 0.0 }
  0x53   : > { %v346_v30 = vsel %vm1027_vm4, %v343_v63, %v340_v16  ;;  %v376_v20 = vmul.f32 0.6931472, %v669_v28  ;;  %v671_v35 = vpop.eup %670  ;;  %680 = vlog2.f32 %v329_v38  ;;  %v296_v58 = vmul.f32 -0.5, %v1015_v53 }
  0x54   : > { %v410_v32 = vsub.f32 %v274_v21, %v346_v30  ;;  %v364_v37 = vsel %vm1033_vm5, %v361_v9, %v358_v31  ;;  %v394_v41 = vmul.f32 0.6931472, %v671_v35  ;;  %682 = vlog2.f32 %v365_v50 }
  0x55   : > { %v382_v40 = vsel %vm1039_vm6, %v379_v24, %v376_v20  ;;  %v412_v42 = vsub.f32 %v292_v29, %v364_v37  ;;  %v350_v59 = vmul.f32 -0.5, %v1049_v19  ;;  %v383_v61 = vadd.f32 1.0, %v1078_v47 }
  0x56   : > { %v418_v43 = vmul.f32 %v410_v32, %v410_v32  ;;  %v414_v45 = vsub.f32 %v310_v17, %v382_v40  ;;  %v400_v48 = vsel %vm1055_vm7, %v397_v25, %v394_v41  ;;  %v279_v62 = vadd.f32 1.0, %v278_v54 }
  0x57   : > { %v420_v49 = vmul.f32 %v412_v42, %v412_v42  ;;  %v416_v51 = vsub.f32 %v328_v36, %v400_v48  ;;  %v281_v63 = vand.u32 2147483647, %v1009_v44  ;;  %v314_v0 = vmul.f32 -0.5, %v1045_v15 }
  0x58   : > { %v422_v52 = vmul.f32 %v414_v45, %v414_v45  ;;  %v368_v3 = vmul.f32 -0.5, %v1059_v27  ;;  %684 = vlog2.f32 %v383_v61  ;;  %v401_v4 = vadd.f32 1.0, %v1084_v56 }
  0x59   : > { %v426_v55 = vadd.f32 %v420_v49, %v418_v43  ;;  %v424_v57 = vmul.f32 %v416_v51, %v416_v51  ;;  %v673_v1 = vpop.eup %672  ;;  %v297_v5 = vadd.f32 1.0, %v296_v58  ;;  %v351_v6 = vadd.f32 1.0, %v350_v59 }
  0x5a   : > { %v299_v8 = vand.u32 2147483647, %v1015_v53  ;;  %v353_v9 = vand.u32 2147483647, %v1049_v19  ;;  %686 = vlog2.f32 %v401_v4  ;;  %v277_v10 = vmul.f32 0.6931472, %v673_v1 }
  0x5b   : > { %v427_v60 = vadd.f32 %v426_v55, %v422_v52  ;;  %v675_v7 = vpop.eup %674  ;;  %v280_v11 = vmul.f32 %v279_v62, %v1009_v44  ;;  %vm1097_vm8 = vcmp.lt.f32.partialorder %v281_v63, 0.0004427343  ;;  %v315_v13 = vadd.f32 1.0, %v314_v0 }
  0x5c   : > { %v332_v14 = vmul.f32 -0.5, %v1047_v18  ;;  %v369_v21 = vadd.f32 1.0, %v368_v3  ;;  %v386_v22 = vmul.f32 -0.5, %v1078_v47  ;;  %v295_v16 = vmul.f32 0.6931472, %v675_v7 }
  0x5d   : > { %v428_v2 = vadd.f32 %v427_v60, %v424_v57  ;;  %v298_v23 = vmul.f32 %v297_v5, %v1015_v53  ;;  %v352_v24 = vmul.f32 %v351_v6, %v1049_v19  ;;  %v371_v44 = vand.u32 2147483647, %v1059_v27 }
  0x5e   : > { %v677_v25 = vpop.eup %676  ;;  %vm1109_vm9 = vcmp.lt.f32.partialorder %v299_v8, 0.0004427343  ;;  %vm1113_vm10 = vcmp.lt.f32.partialorder %v353_v9, 0.0004427343  ;;  %v404_v29 = vmul.f32 -0.5, %v1084_v56  ;;  %v283_v31 = vsel %vm1097_vm8, %v280_v11, %v277_v10 }
  0x5f   : > { %436 = vst [vmem:[%s1101_s19] sm:$0xff] %v428_v2  ;;  %v679_v30 = vpop.eup %678  ;;  %v317_v53 = vand.u32 2147483647, %v1045_v15  ;;  %v335_v19 = vand.u32 2147483647, %v1047_v18  ;;  %v349_v17 = vmul.f32 0.6931472, %v677_v25  ;;  %v316_v32 = vmul.f32 %v315_v13, %v1045_v15 }
  0x60   : > { %v681_v20 = vpop.eup %680  ;;  %v333_v33 = vadd.f32 1.0, %v332_v14  ;;  %v370_v34 = vmul.f32 %v369_v21, %v1059_v27  ;;  %v387_v35 = vadd.f32 1.0, %v386_v22  ;;  %v301_v37 = vsel %vm1109_vm9, %v298_v23, %v295_v16 }
  0x61   : > { %v683_v36 = vpop.eup %682  ;;  %v355_v38 = vsel %vm1113_vm10, %v352_v24, %v349_v17  ;;  %vm372_vm11 = vcmp.lt.f32.partialorder %v371_v44, 0.0004427343  ;;  %v389_v39 = vand.u32 2147483647, %v1078_v47  ;;  %v313_v40 = vmul.f32 0.6931472, %v679_v30 }
  0x62   : > { %v367_v41 = vmul.f32 0.6931472, %v683_v36  ;;  %v405_v42 = vadd.f32 1.0, %v404_v29  ;;  %v411_v43 = vsub.f32 %v283_v31, %v355_v38  ;;  %vm1129_vm12 = vcmp.lt.f32.partialorder %v317_v53, 0.0004427343 }
  0x63   : > { %v407_v27 = vand.u32 2147483647, %v1084_v56  ;;  %v331_v45 = vmul.f32 0.6931472, %v681_v20  ;;  %v334_v46 = vmul.f32 %v333_v33, %v1047_v18  ;;  %v388_v49 = vmul.f32 %v387_v35, %v1078_v47 }
  0x64   : > { %v373_v48 = vsel %vm372_vm11, %v370_v34, %v367_v41  ;;  %vm1136_vm13 = vcmp.lt.f32.partialorder %v335_v19, 0.0004427343  ;;  %vm390_vm14 = vcmp.lt.f32.partialorder %v389_v39, 0.0004427343  ;;  %v419_v54 = vmul.f32 %v411_v43, %v411_v43 }
  0x65   : > { %v685_v50 = vpop.eup %684  ;;  %v413_v52 = vsub.f32 %v301_v37, %v373_v48  ;;  %v319_v55 = vsel %vm1129_vm12, %v316_v32, %v313_v40  ;;  %v406_v58 = vmul.f32 %v405_v42, %v1084_v56  ;;  %vm408_vm15 = vcmp.lt.f32.partialorder %v407_v27, 0.0004427343 }
  0x66   : > { %v385_v57 = vmul.f32 0.6931472, %v685_v50  ;;  %v337_v47 = vsel %vm1136_vm13, %v334_v46, %v331_v45 }
  0x67   : > { %v687_v18 = vpop.eup %686  ;;  %v421_v59 = vmul.f32 %v413_v52, %v413_v52 }
  0x68   : > { %v391_v60 = vsel %vm390_vm14, %v388_v49, %v385_v57  ;;  %v403_v61 = vmul.f32 0.6931472, %v687_v18 }
  0x69   : > { %v415_v62 = vsub.f32 %v319_v55, %v391_v60  ;;  %v429_v63 = vadd.f32 %v421_v59, %v419_v54 }
  0x6a   : > { %v409_v0 = vsel %vm408_vm15, %v406_v58, %v403_v61 }
  0x6b   : > { %v417_v1 = vsub.f32 %v337_v47, %v409_v0  ;;  %v423_v2 = vmul.f32 %v415_v62, %v415_v62 }
  0x6d   : > { %v425_v3 = vmul.f32 %v417_v1, %v417_v1  ;;  %v430_v4 = vadd.f32 %v429_v63, %v423_v2 }
  0x6f   : > { %v431_v56 = vadd.f32 %v430_v4, %v425_v3 }
  0x71   : > { %437 = vst [vmem:[%s1101_s19 + $0x8] sm:$0xff] %v431_v56 }
  0x72   : > { %757 = shalt.err (!%p754_p7)
}
  0x73   : > { %s758_s12 = scalar_lea.hbm %s451_s8, 256  ;;  %s762_s6 = scalar_lea.hbm %s1189_s2, 512 }
  0x74   : > { %p759_p10 = scmp.ne.s32.totalorder %s451_s8, %s758_s12  ;;  %p763_p3 = scmp.lt.s32.totalorder %s451_s8, %s1189_s2 }
  0x75   : > { %p764_p8 = scmp.lt.s32.totalorder %s762_s6, %s758_s12 }
  0x76   : > { %p760_p1 = pnand %p759_p10, %p901_p9 }
  0x77   : > { %p765_p0 = por %p764_p8, %p763_p3 }
  0x78   : > { %p761_p13 = pneg %p760_p1 }
  0x7a   : > { %p766_p12 = pnand %p765_p0, %p761_p13 }
  0x7c   : > { %769 = shalt.err (!%p766_p12)
}
  0x7d   : > { %590 = dma.vmem_to_hbm [thread:$0]  (%p901_p9), %s454_s29, 256, %s451_s8, %s439_s15  }
  0x7e PF: > { %s465_s18 = sand.u32 1, %s808_s9   ;;  %p1222_p2 = scmp.ge.s32.totalorder %s828_s14, 2 }
  0x7f   : > { %s466_s21 = scalar_lea.sflag [#allocation4], %s465_s18 }
  0x80   : > { %p600_p5 = pnand %p1222_p2, %p908_p11 }
  0x82   : > { %p601_p6 = pneg %p600_p5 }
  0x84   : > { %803 = dma.done.wait (%p601_p6), %s466_s21, 256  }
  0x85   : > { %805 = vsyncadd (%p601_p6), %s466_s21, 4294967040  ;;  %s21_s14 = sadd.s32 1, %s828_s14   ;;  %s1223_s9 = smov %s812_s10 }
  0x86   : > { %p18_p4 = scmp.ge.s32.totalorder %s21_s14, 4   ;;  %s1224_s10 = smov %s816_s11 }
  0x87   : > { %s1225_s11 = smov %s906_s23  ;;  %s1226_s12 = smov %s824_s13 }
  0x88   : > { %s1227_s13 = smov %s1229_s17  ;;  %20 = sbr.rel (!%p18_p4) target bundleno = 8 (0x8), region = 90 }
  0x8d   :  { %471 = vsyncpa [#allocation3], 1 }
  0x8e   :  { %473 = vsyncpa [#allocation3 + $0x1], 1 }
  0x8f   :  { %474 = vsyncpa [#allocation6], 1 }
  0x90   :  { %476 = vsyncpa [#allocation6 + $0x1], 1 }
  0x91   :  { %477 = vsyncpa [#allocation4], 1 }
  0x92   :  { %479 = vsyncpa [#allocation4 + $0x1], 1 }

</bundles_post_ra>
